<compile_context>
chip_gen: v5e
topology: v5e:2x2
jax: 0.10.0
libtpu: 0.0.40
codegen_flags: <defaults>
</compile_context>

<pallas_src>
import math

import jax
import jax.numpy as jnp
import numpy as np
from jax.experimental import pallas as pl
from jax.experimental.pallas import tpu as pltpu

LANE = 128
SUBLANE = 8


def _round_up(x: int, m: int) -> int:
    return (x + m - 1) // m * m


def _cdiv(a: int, b: int) -> int:
    return (a + b - 1) // b


def embedding_rule(input_dim: int, i: int) -> int:
    if i == 0:
        return math.ceil(input_dim ** 0.25)
    if i == 1:
        return min(50, (input_dim + 1) // 2)
    return 10


# ----------------------------------------------------------------------------
# Parameter init (matches torch defaults) and padding / folding prep
# ----------------------------------------------------------------------------
def init_params(key, input_dim, embedding_input_dims, hidden_layer_sizes,
                output_dimension, emb_rule=0):
    n_lin = len(hidden_layer_sizes) + 1
    keys = jax.random.split(key, len(embedding_input_dims) + 2 * n_lin)
    k = 0

    embeddings = []
    for vocab in embedding_input_dims:
        d = embedding_rule(vocab, emb_rule)
        # nn.Embedding default init: N(0, 1)
        embeddings.append(jax.random.normal(keys[k], (vocab, d), jnp.float32))
        k += 1

    seq_in = input_dim + sum(embedding_rule(v, emb_rule)
                             for v in embedding_input_dims)
    dims = [seq_in] + list(hidden_layer_sizes) + [output_dimension]
    weights = []
    for din, dout in zip(dims[:-1], dims[1:]):
        # nn.Linear default init: U(-1/sqrt(fan_in), 1/sqrt(fan_in))
        bound = 1.0 / math.sqrt(din)
        w = jax.random.uniform(keys[k], (din, dout), jnp.float32, -bound, bound)
        k += 1
        b = jax.random.uniform(keys[k], (1, dout), jnp.float32, -bound, bound)
        k += 1
        weights.append((w, b))

    return {"embeddings": embeddings, "weights": weights}


def prepare_params(params, input_dim):
    """Fold embeddings into the first Linear, concat folded tables, zero-pad.

    Invariant: padded weight ROWS (and padded bias lanes) are exactly zero so
    that nonzero activations on padded hidden lanes cannot leak downstream.
    """
    embeddings = params["embeddings"]
    weights = params["weights"]
    w0, b0 = weights[0]
    h0 = w0.shape[1]
    h0p = _round_up(h0, LANE)

    # Feature slice of the first Linear.  No lane padding on the contraction
    # dim: the feature block keeps its full extent, so K = input_dim.
    w_feat = jnp.zeros((input_dim, h0p), jnp.float32).at[:, :h0].set(
        w0[:input_dim])
    b0p = jnp.zeros((1, h0p), jnp.float32).at[:, :h0].set(b0)

    # Folded embedding tables  T_k = E_k @ W0_slice_k  (exact for a linear
    # layer), concatenated along the vocab axis into ONE table so the kernel
    # performs a single multi-hot matmul.  vocab axis rounded to 128 lanes.
    folded, offsets = [], []
    off, voff = input_dim, 0
    for emb in embeddings:
        vocab, d = emb.shape
        folded.append(emb @ w0[off:off + d])
        offsets.append(voff)
        off += d
        voff += vocab
    if folded:
        vpad = _round_up(voff, LANE)
        table = jnp.zeros((vpad, h0p), jnp.float32).at[:voff, :h0].set(
            jnp.concatenate(folded, axis=0))
    else:
        table = jnp.zeros((SUBLANE, h0p), jnp.float32)

    layers = []
    for (w, b) in weights[1:]:
        din, dout = w.shape
        dinp, doutp = _round_up(din, LANE), _round_up(dout, LANE)
        layers.append((
            jnp.zeros((dinp, doutp), jnp.float32).at[:din, :dout].set(w),
            jnp.zeros((1, doutp), jnp.float32).at[:, :dout].set(b),
        ))

    return {"w_feat": w_feat, "b0": b0p, "table": table,
            "emb_offsets": offsets, "layers": layers,
            "input_dim": input_dim, "out_dim": weights[-1][0].shape[1]}


# ----------------------------------------------------------------------------
# Kernel
# ----------------------------------------------------------------------------
def make_kernel(num_emb, num_layers, activation, use_bf16=False):
    act_fns = {
        "relu": lambda h: jnp.maximum(h, 0.0),
        "tanh": jnp.tanh,
        "sigmoid": jax.nn.sigmoid,
        "leaky_relu": lambda h: jnp.where(h > 0, h, 0.01 * h),
    }
    act = act_fns.get(activation, act_fns["relu"])

    def mxu(a, w):
        # Optional bf16 MXU feed (f32 accumulate stays).  Off at tiny shapes.
        if use_bf16:
            a = a.astype(jnp.bfloat16)
            w = w.astype(jnp.bfloat16)
        return jnp.dot(a, w, preferred_element_type=jnp.float32)

    def kernel(feat_ref, idx_ref, table_ref, wfeat_ref, b0_ref, *rest):
        wb = rest[:-1]            # [W1, b1, ..., W_{L-1}, b_{L-1}]
        out_ref = rest[-1]
        tb = feat_ref.shape[0]

        # First Linear fused with embedding lookup + concat:
        #   h = feat @ W0_feat + multihot(idx + offsets) @ T_all + b0
        h = mxu(feat_ref[...], wfeat_ref[...])
        if num_emb > 0:
            idx = idx_ref[...]                       # (tb, num_emb), pre-offset
            vpad = table_ref.shape[0]
            iota = jax.lax.broadcasted_iota(jnp.int32, (tb, vpad), 1)
            mh = (iota == idx[:, 0:1]).astype(jnp.float32)
            for k in range(1, num_emb):
                mh = mh + (iota == idx[:, k:k + 1]).astype(jnp.float32)
            # NOTE: out-of-range / negative indices silently contribute zero
            # (torch's nn.Embedding would raise).
            # TODO(synk): for very large vocabularies, switch to a scalar-
            # prefetch row-gather instead of the one-hot matmul (VMEM / MXU
            # cost here grows with vocab size).
            h = h + mxu(mh, table_ref[...])
        h = h + b0_ref[...]
        if num_layers > 1:
            h = act(h)

        # Remaining Linear layers; activation after every layer but the last.
        # TODO(synk): nn.Dropout(0.5) before the final Linear is identity in
        # eval mode; training-mode stochastic dropout is not modeled.
        # TODO(synk): optional BatchNorm1d (batch_normalization=True) is not
        # modeled (module default is off).
        for i in range(num_layers - 1):
            h = mxu(h, wb[2 * i][...]) + wb[2 * i + 1][...]
            if i < num_layers - 2:
                h = act(h)
        out_ref[...] = h.astype(out_ref.dtype)       # lane-dense store

    return kernel


# ----------------------------------------------------------------------------
# Wrapper
# ----------------------------------------------------------------------------
def _num_tensorcores() -> int:
    try:
        info = pltpu.get_tpu_info()
        for name in ("num_cores", "num_tensorcores", "tensorcores_per_chip",
                     "core_count", "cores_per_chip"):
            v = getattr(info, name, None)
            if isinstance(v, int) and v > 0:
                return v
    except Exception:
        pass
    return 1


def _vmem_capacity_bytes() -> int:
    try:
        v = pltpu.get_tpu_info().vmem_capacity_bytes
        if isinstance(v, int) and v > 0:
            return v
    except Exception:
        pass
    return 64 * 1024 * 1024   # conservative (v7x per-TensorCore)


def embedding_mlp_forward(prep, feature, embedding_features,
                          activation="relu", tile_b=None, tile_b_cap=1024,
                          use_bf16=None):
    B = feature.shape[0]
    input_dim = prep["input_dim"]
    num_emb = len(prep["emb_offsets"])
    num_layers = len(prep["layers"]) + 1
    out_pad = (prep["layers"][-1][0].shape[1] if prep["layers"]
               else prep["b0"].shape[1])
    h0p = prep["b0"].shape[1]
    vpad = prep["table"].shape[0]

    if use_bf16 is None:
        use_bf16 = max([h0p, vpad] + [w.shape[1] for w, _ in prep["layers"]]) >= 512

    # ---- batch tiling: big balanced tiles; >= num_cores "parallel" tiles on
    #      multi-TensorCore chips (v7x) for non-trivial batches.
    n_cores = _num_tensorcores()
    if tile_b is None:
        n_tiles = max(_cdiv(B, tile_b_cap), 1)
        if n_cores > 1 and B > 256:
            n_tiles = max(n_tiles, n_cores)
        tile_b = _round_up(_cdiv(B, n_tiles), SUBLANE)
    n_tiles = _cdiv(B, tile_b)
    b_pad = n_tiles * tile_b

    # ---- inputs: no lane padding of the feature dim, at most <8 pad rows.
    feat = feature.astype(jnp.float32)
    if num_emb > 0:
        idx = jnp.stack([jnp.asarray(e, jnp.int32) + int(off)
                         for e, off in zip(embedding_features,
                                           prep["emb_offsets"])], axis=1)
    else:
        idx = jnp.zeros((B, 1), jnp.int32)
    if b_pad > B:
        feat = jnp.pad(feat, ((0, b_pad - B), (0, 0)))
        idx = jnp.pad(idx, ((0, b_pad - B), (0, 0)))

    args = [feat, idx, prep["table"], prep["w_feat"], prep["b0"]]
    for (w, b) in prep["layers"]:
        args += [w, b]

    def build_specs(single_buffer_consts):
        kw = ({"pipeline_mode": pl.Buffered(1)} if single_buffer_consts else {})
        const = lambda shape: pl.BlockSpec(shape, lambda i: (0, 0), **kw)
        specs = [pl.BlockSpec((tile_b, input_dim), lambda i: (i, 0)),
                 pl.BlockSpec((tile_b, idx.shape[1]), lambda i: (i, 0)),
                 const(prep["table"].shape),
                 const(prep["w_feat"].shape),
                 const(prep["b0"].shape)]
        for (w, b) in prep["layers"]:
            specs.append(const(w.shape))
            specs.append(const(b.shape))
        return specs

    grid = (n_tiles,)
    sem = ("parallel",) if n_tiles > 1 else ("arbitrary",)

    # ---- VMEM budget (default scoped limit is well below physical) + cost.
    streamed = (tile_b * input_dim + tile_b * idx.shape[1]
                + tile_b * out_pad) * 4
    resident = sum(int(np.prod(a.shape)) for a in args[2:]) * 4
    temps = 4 * tile_b * max(h0p, vpad, out_pad) * 4
    vmem_limit = int(min(int(_vmem_capacity_bytes() * 0.9),
                         max(32 << 20,
                             2 * streamed + 2 * resident + temps + (8 << 20))))

    flops = 2 * b_pad * (input_dim + (vpad if num_emb else 0)) * h0p
    for (w, _) in prep["layers"]:
        flops += 2 * b_pad * w.shape[0] * w.shape[1]
    transcendentals = (b_pad * (num_layers - 1) * h0p
                       if activation in ("tanh", "sigmoid") else 0)
    bytes_accessed = int(sum(int(a.size) for a in args) * 4 + b_pad * out_pad * 4)
    cost = pl.CostEstimate(flops=int(flops), transcendentals=int(transcendentals),
                           bytes_accessed=bytes_accessed)

    kernel = make_kernel(num_emb, num_layers, activation, use_bf16)
    out_shape = jax.ShapeDtypeStruct((b_pad, out_pad), jnp.float32)
    out_spec = pl.BlockSpec((tile_b, out_pad), lambda i: (i, 0))
    cparams = pltpu.CompilerParams(dimension_semantics=sem,
                                   vmem_limit_bytes=vmem_limit)

    def run(single_buffer_consts):
        return pl.pallas_call(
            kernel,
            out_shape=out_shape,
            grid=grid,
            in_specs=build_specs(single_buffer_consts),
            out_specs=out_spec,
            compiler_params=cparams,
            cost_estimate=cost,
        )(*args)

    try:
        # Constant operands only DMA on step 0 — single-buffer them.
        out = run(True)
    except Exception:
        out = run(False)

    return out[:B, :prep["out_dim"]]


# ----------------------------------------------------------------------------
# Pure-JAX reference (mirrors the torch module exactly, unpadded / unfused)
# ----------------------------------------------------------------------------
def reference_forward(params, feature, embedding_features, activation="relu"):
    embedded = [tab[idx] for tab, idx in
                zip(params["embeddings"], embedding_features)]
    h = jnp.concatenate([feature.astype(jnp.float32)] + embedded, axis=1)
    ws = params["weights"]
    for i, (w, b) in enumerate(ws):
        h = h @ w + b
        if i < len(ws) - 1:
            if activation == "relu":
                h = jnp.maximum(h, 0.0)
            elif activation == "tanh":
                h = jnp.tanh(h)
            elif activation == "sigmoid":
                h = jax.nn.sigmoid(h)
            else:
                h = jnp.where(h > 0, h, 0.01 * h)
    return h


if __name__ == "__main__":
    input_dim = 16
    embedding_input_dims = [100, 20]   # emb dims: ceil(100^.25)=4, ceil(20^.25)=3
    hidden_layer_sizes = [32, 32]
    output_dimension = 4
    batch = 16

    key = jax.random.PRNGKey(0)
    k_par, k_feat, k_e0, k_e1 = jax.random.split(key, 4)

    params = init_params(k_par, input_dim, embedding_input_dims,
                         hidden_layer_sizes, output_dimension)
    prep = prepare_params(params, input_dim)

    feature = jax.random.normal(k_feat, (batch, input_dim), jnp.float32)
    emb0 = jax.random.randint(k_e0, (batch,), 0, embedding_input_dims[0],
                              dtype=jnp.int32)
    emb1 = jax.random.randint(k_e1, (batch,), 0, embedding_input_dims[1],
                              dtype=jnp.int32)

    out = embedding_mlp_forward(prep, feature, [emb0, emb1])
    out = jax.block_until_ready(out)

    ref = reference_forward(params, feature, [emb0, emb1])
    np.testing.assert_allclose(np.asarray(out), np.asarray(ref),
                               rtol=1e-4, atol=1e-5)
    print("KERNEL_OK")
</pallas_src>

<mosaic_0001>
module attributes {stable_mosaic.version = 11 : i64} {
  func.func @kernel(%arg0: i32, %arg1: memref<16x16xf32, #tpu.memory_space<vmem>>, %arg2: memref<16x2xi32, #tpu.memory_space<vmem>>, %arg3: memref<128x128xf32, #tpu.memory_space<vmem>>, %arg4: memref<16x128xf32, #tpu.memory_space<vmem>>, %arg5: memref<1x128xf32, #tpu.memory_space<vmem>>, %arg6: memref<128x128xf32, #tpu.memory_space<vmem>>, %arg7: memref<1x128xf32, #tpu.memory_space<vmem>>, %arg8: memref<128x128xf32, #tpu.memory_space<vmem>>, %arg9: memref<1x128xf32, #tpu.memory_space<vmem>>, %arg10: memref<16x128xf32, #tpu.memory_space<vmem>>) attributes {dimension_semantics = [#tpu.dimension_semantics<arbitrary>], iteration_bounds = array<i64: 1>, scalar_prefetch = 0 : i64, scratch_operands = 0 : i64, tpu.core_type = #tpu.core_type<tc>, window_params = [{transform_indices = @transform_0, window_bounds = array<i64: 16, 16>}, {transform_indices = @transform_1, window_bounds = array<i64: 16, 2>}, {pipeline_mode = #tpu.pipeline_mode<synchronous>, transform_indices = @transform_2, window_bounds = array<i64: 128, 128>}, {pipeline_mode = #tpu.pipeline_mode<synchronous>, transform_indices = @transform_3, window_bounds = array<i64: 16, 128>}, {pipeline_mode = #tpu.pipeline_mode<synchronous>, transform_indices = @transform_4, window_bounds = array<i64: 1, 128>}, {pipeline_mode = #tpu.pipeline_mode<synchronous>, transform_indices = @transform_5, window_bounds = array<i64: 128, 128>}, {pipeline_mode = #tpu.pipeline_mode<synchronous>, transform_indices = @transform_6, window_bounds = array<i64: 1, 128>}, {pipeline_mode = #tpu.pipeline_mode<synchronous>, transform_indices = @transform_7, window_bounds = array<i64: 128, 128>}, {pipeline_mode = #tpu.pipeline_mode<synchronous>, transform_indices = @transform_8, window_bounds = array<i64: 1, 128>}, {transform_indices = @transform_9, window_bounds = array<i64: 16, 128>}]} {
    %c0 = arith.constant 0 : index
    %c0_0 = arith.constant 0 : index
    %0 = vector.load %arg1[%c0, %c0_0] : memref<16x16xf32, #tpu.memory_space<vmem>>, vector<16x16xf32>
    %c0_1 = arith.constant 0 : index
    %c0_2 = arith.constant 0 : index
    %1 = vector.load %arg4[%c0_1, %c0_2] : memref<16x128xf32, #tpu.memory_space<vmem>>, vector<16x128xf32>
    %cst = arith.constant dense<0.000000e+00> : vector<16x128xf32>
    %2 = tpu.matmul %0, %1, %cst {dimension_numbers = #tpu.dot_dimension_numbers<[1], [0], [0], [1], [0, 0, 1, 1], [], []>} : vector<16x16xf32>, vector<16x128xf32>, vector<16x128xf32> -> vector<16x128xf32>
    %c0_3 = arith.constant 0 : index
    %c0_4 = arith.constant 0 : index
    %3 = vector.load %arg2[%c0_3, %c0_4] : memref<16x2xi32, #tpu.memory_space<vmem>>, vector<16x2xi32>
    %4 = tpu.iota {dimensions = array<i32: 1>} : vector<16x128xi32>
    %5 = vector.extract_strided_slice %3 {offsets = [0, 0], sizes = [16, 1], strides = [1, 1]} : vector<16x2xi32> to vector<16x1xi32>
    %6 = vector.broadcast %5 : vector<16x1xi32> to vector<16x128xi32>
    %7 = arith.cmpi eq, %4, %6 : vector<16x128xi32>
    %8 = arith.extui %7 : vector<16x128xi1> to vector<16x128xi32>
    %9 = arith.sitofp %8 : vector<16x128xi32> to vector<16x128xf32>
    %10 = vector.extract_strided_slice %3 {offsets = [0, 1], sizes = [16, 1], strides = [1, 1]} : vector<16x2xi32> to vector<16x1xi32>
    %11 = vector.broadcast %10 : vector<16x1xi32> to vector<16x128xi32>
    %12 = arith.cmpi eq, %4, %11 : vector<16x128xi32>
    %13 = arith.extui %12 : vector<16x128xi1> to vector<16x128xi32>
    %14 = arith.sitofp %13 : vector<16x128xi32> to vector<16x128xf32>
    %15 = arith.addf %9, %14 : vector<16x128xf32>
    %c0_5 = arith.constant 0 : index
    %c0_6 = arith.constant 0 : index
    %16 = vector.load %arg3[%c0_5, %c0_6] : memref<128x128xf32, #tpu.memory_space<vmem>>, vector<128x128xf32>
    %cst_7 = arith.constant dense<0.000000e+00> : vector<16x128xf32>
    %17 = tpu.matmul %15, %16, %cst_7 {dimension_numbers = #tpu.dot_dimension_numbers<[1], [0], [0], [1], [0, 0, 1, 1], [], []>} : vector<16x128xf32>, vector<128x128xf32>, vector<16x128xf32> -> vector<16x128xf32>
    %18 = arith.addf %2, %17 : vector<16x128xf32>
    %c0_8 = arith.constant 0 : index
    %c0_9 = arith.constant 0 : index
    %19 = vector.load %arg5[%c0_8, %c0_9] : memref<1x128xf32, #tpu.memory_space<vmem>>, vector<1x128xf32>
    %20 = vector.broadcast %19 : vector<1x128xf32> to vector<16x128xf32>
    %21 = arith.addf %18, %20 : vector<16x128xf32>
    %cst_10 = arith.constant 0.000000e+00 : f32
    %22 = vector.broadcast %cst_10 : f32 to vector<16x128xf32>
    %23 = arith.maximumf %21, %22 : vector<16x128xf32>
    %c0_11 = arith.constant 0 : index
    %c0_12 = arith.constant 0 : index
    %24 = vector.load %arg6[%c0_11, %c0_12] : memref<128x128xf32, #tpu.memory_space<vmem>>, vector<128x128xf32>
    %cst_13 = arith.constant dense<0.000000e+00> : vector<16x128xf32>
    %25 = tpu.matmul %23, %24, %cst_13 {dimension_numbers = #tpu.dot_dimension_numbers<[1], [0], [0], [1], [0, 0, 1, 1], [], []>} : vector<16x128xf32>, vector<128x128xf32>, vector<16x128xf32> -> vector<16x128xf32>
    %c0_14 = arith.constant 0 : index
    %c0_15 = arith.constant 0 : index
    %26 = vector.load %arg7[%c0_14, %c0_15] : memref<1x128xf32, #tpu.memory_space<vmem>>, vector<1x128xf32>
    %27 = vector.broadcast %26 : vector<1x128xf32> to vector<16x128xf32>
    %28 = arith.addf %25, %27 : vector<16x128xf32>
    %cst_16 = arith.constant 0.000000e+00 : f32
    %29 = vector.broadcast %cst_16 : f32 to vector<16x128xf32>
    %30 = arith.maximumf %28, %29 : vector<16x128xf32>
    %c0_17 = arith.constant 0 : index
    %c0_18 = arith.constant 0 : index
    %31 = vector.load %arg8[%c0_17, %c0_18] : memref<128x128xf32, #tpu.memory_space<vmem>>, vector<128x128xf32>
    %cst_19 = arith.constant dense<0.000000e+00> : vector<16x128xf32>
    %32 = tpu.matmul %30, %31, %cst_19 {dimension_numbers = #tpu.dot_dimension_numbers<[1], [0], [0], [1], [0, 0, 1, 1], [], []>} : vector<16x128xf32>, vector<128x128xf32>, vector<16x128xf32> -> vector<16x128xf32>
    %c0_20 = arith.constant 0 : index
    %c0_21 = arith.constant 0 : index
    %33 = vector.load %arg9[%c0_20, %c0_21] : memref<1x128xf32, #tpu.memory_space<vmem>>, vector<1x128xf32>
    %34 = vector.broadcast %33 : vector<1x128xf32> to vector<16x128xf32>
    %35 = arith.addf %32, %34 : vector<16x128xf32>
    %c0_22 = arith.constant 0 : index
    %c0_23 = arith.constant 0 : index
    %36 = vector.load %arg10[%c0_22, %c0_23] : memref<16x128xf32, #tpu.memory_space<vmem>>, vector<16x128xf32>
    tpu.vector_store %arg10[%c0_22, %c0_23], %35 {strides = array<i32>} : memref<16x128xf32, #tpu.memory_space<vmem>>, vector<16x128xf32>,
    return
  }
  func.func @transform_0(%arg0: i32) -> (i32, i32) {
    %c0_i32 = arith.constant 0 : i32
    %c0_i32_0 = arith.constant 0 : i32
    return %arg0, %c0_i32 : i32, i32
  }
  func.func @transform_1(%arg0: i32) -> (i32, i32) {
    %c0_i32 = arith.constant 0 : i32
    %c0_i32_0 = arith.constant 0 : i32
    return %arg0, %c0_i32 : i32, i32
  }
  func.func @transform_2(%arg0: i32) -> (i32, i32) {
    %c0_i32 = arith.constant 0 : i32
    %c0_i32_0 = arith.constant 0 : i32
    %c0_i32_1 = arith.constant 0 : i32
    return %c0_i32, %c0_i32_0 : i32, i32
  }
  func.func @transform_3(%arg0: i32) -> (i32, i32) {
    %c0_i32 = arith.constant 0 : i32
    %c0_i32_0 = arith.constant 0 : i32
    %c0_i32_1 = arith.constant 0 : i32
    return %c0_i32, %c0_i32_0 : i32, i32
  }
  func.func @transform_4(%arg0: i32) -> (i32, i32) {
    %c0_i32 = arith.constant 0 : i32
    %c0_i32_0 = arith.constant 0 : i32
    %c0_i32_1 = arith.constant 0 : i32
    return %c0_i32, %c0_i32_0 : i32, i32
  }
  func.func @transform_5(%arg0: i32) -> (i32, i32) {
    %c0_i32 = arith.constant 0 : i32
    %c0_i32_0 = arith.constant 0 : i32
    %c0_i32_1 = arith.constant 0 : i32
    return %c0_i32, %c0_i32_0 : i32, i32
  }
  func.func @transform_6(%arg0: i32) -> (i32, i32) {
    %c0_i32 = arith.constant 0 : i32
    %c0_i32_0 = arith.constant 0 : i32
    %c0_i32_1 = arith.constant 0 : i32
    return %c0_i32, %c0_i32_0 : i32, i32
  }
  func.func @transform_7(%arg0: i32) -> (i32, i32) {
    %c0_i32 = arith.constant 0 : i32
    %c0_i32_0 = arith.constant 0 : i32
    %c0_i32_1 = arith.constant 0 : i32
    return %c0_i32, %c0_i32_0 : i32, i32
  }
  func.func @transform_8(%arg0: i32) -> (i32, i32) {
    %c0_i32 = arith.constant 0 : i32
    %c0_i32_0 = arith.constant 0 : i32
    %c0_i32_1 = arith.constant 0 : i32
    return %c0_i32, %c0_i32_0 : i32, i32
  }
  func.func @transform_9(%arg0: i32) -> (i32, i32) {
    %c0_i32 = arith.constant 0 : i32
    %c0_i32_0 = arith.constant 0 : i32
    return %arg0, %c0_i32 : i32, i32
  }
}

module attributes {stable_mosaic.version = 11 : i64} {
  func.func @kernel(%arg0: i32, %arg1: memref<16x16xf32, #tpu.memory_space<vmem>>, %arg2: memref<16x2xi32, #tpu.memory_space<vmem>>, %arg3: memref<128x128xf32, #tpu.memory_space<vmem>>, %arg4: memref<16x128xf32, #tpu.memory_space<vmem>>, %arg5: memref<1x128xf32, #tpu.memory_space<vmem>>, %arg6: memref<128x128xf32, #tpu.memory_space<vmem>>, %arg7: memref<1x128xf32, #tpu.memory_space<vmem>>, %arg8: memref<128x128xf32, #tpu.memory_space<vmem>>, %arg9: memref<1x128xf32, #tpu.memory_space<vmem>>, %arg10: memref<16x128xf32, #tpu.memory_space<vmem>>) attributes {dimension_semantics = [#tpu.dimension_semantics<arbitrary>], iteration_bounds = array<i64: 1>, scalar_prefetch = 0 : i64, scratch_operands = 0 : i64, tpu.core_type = #tpu.core_type<tc>, window_params = [{transform_indices = @transform_0, window_bounds = array<i64: 16, 16>}, {transform_indices = @transform_1, window_bounds = array<i64: 16, 2>}, {pipeline_mode = #tpu.pipeline_mode<synchronous>, transform_indices = @transform_2, window_bounds = array<i64: 128, 128>}, {pipeline_mode = #tpu.pipeline_mode<synchronous>, transform_indices = @transform_3, window_bounds = array<i64: 16, 128>}, {pipeline_mode = #tpu.pipeline_mode<synchronous>, transform_indices = @transform_4, window_bounds = array<i64: 1, 128>}, {pipeline_mode = #tpu.pipeline_mode<synchronous>, transform_indices = @transform_5, window_bounds = array<i64: 128, 128>}, {pipeline_mode = #tpu.pipeline_mode<synchronous>, transform_indices = @transform_6, window_bounds = array<i64: 1, 128>}, {pipeline_mode = #tpu.pipeline_mode<synchronous>, transform_indices = @transform_7, window_bounds = array<i64: 128, 128>}, {pipeline_mode = #tpu.pipeline_mode<synchronous>, transform_indices = @transform_8, window_bounds = array<i64: 1, 128>}, {transform_indices = @transform_9, window_bounds = array<i64: 16, 128>}]} {
    %c0 = arith.constant 0 : index
    %c0_0 = arith.constant 0 : index
    %0 = vector.load %arg1[%c0, %c0_0] : memref<16x16xf32, #tpu.memory_space<vmem>>, vector<16x16xf32>
    %c0_1 = arith.constant 0 : index
    %c0_2 = arith.constant 0 : index
    %1 = vector.load %arg4[%c0_1, %c0_2] : memref<16x128xf32, #tpu.memory_space<vmem>>, vector<16x128xf32>
    %cst = arith.constant dense<0.000000e+00> : vector<16x128xf32>
    %2 = tpu.matmul %0, %1, %cst {dimension_numbers = #tpu.dot_dimension_numbers<[1], [0], [0], [1], [0, 0, 1, 1], [], []>} : vector<16x16xf32>, vector<16x128xf32>, vector<16x128xf32> -> vector<16x128xf32>
    %c0_3 = arith.constant 0 : index
    %c0_4 = arith.constant 0 : index
    %3 = vector.load %arg2[%c0_3, %c0_4] : memref<16x2xi32, #tpu.memory_space<vmem>>, vector<16x2xi32>
    %4 = tpu.iota {dimensions = array<i32: 1>} : vector<16x128xi32>
    %5 = vector.extract_strided_slice %3 {offsets = [0, 0], sizes = [16, 1], strides = [1, 1]} : vector<16x2xi32> to vector<16x1xi32>
    %6 = vector.broadcast %5 : vector<16x1xi32> to vector<16x128xi32>
    %7 = arith.cmpi eq, %4, %6 : vector<16x128xi32>
    %8 = arith.extui %7 : vector<16x128xi1> to vector<16x128xi32>
    %9 = arith.sitofp %8 : vector<16x128xi32> to vector<16x128xf32>
    %10 = vector.extract_strided_slice %3 {offsets = [0, 1], sizes = [16, 1], strides = [1, 1]} : vector<16x2xi32> to vector<16x1xi32>
    %11 = vector.broadcast %10 : vector<16x1xi32> to vector<16x128xi32>
    %12 = arith.cmpi eq, %4, %11 : vector<16x128xi32>
    %13 = arith.extui %12 : vector<16x128xi1> to vector<16x128xi32>
    %14 = arith.sitofp %13 : vector<16x128xi32> to vector<16x128xf32>
    %15 = arith.addf %9, %14 : vector<16x128xf32>
    %c0_5 = arith.constant 0 : index
    %c0_6 = arith.constant 0 : index
    %16 = vector.load %arg3[%c0_5, %c0_6] : memref<128x128xf32, #tpu.memory_space<vmem>>, vector<128x128xf32>
    %cst_7 = arith.constant dense<0.000000e+00> : vector<16x128xf32>
    %17 = tpu.matmul %15, %16, %cst_7 {dimension_numbers = #tpu.dot_dimension_numbers<[1], [0], [0], [1], [0, 0, 1, 1], [], []>} : vector<16x128xf32>, vector<128x128xf32>, vector<16x128xf32> -> vector<16x128xf32>
    %18 = arith.addf %2, %17 : vector<16x128xf32>
    %c0_8 = arith.constant 0 : index
    %c0_9 = arith.constant 0 : index
    %19 = vector.load %arg5[%c0_8, %c0_9] : memref<1x128xf32, #tpu.memory_space<vmem>>, vector<1x128xf32>
    %20 = vector.broadcast %19 : vector<1x128xf32> to vector<16x128xf32>
    %21 = arith.addf %18, %20 : vector<16x128xf32>
    %cst_10 = arith.constant 0.000000e+00 : f32
    %22 = vector.broadcast %cst_10 : f32 to vector<16x128xf32>
    %23 = arith.maximumf %21, %22 : vector<16x128xf32>
    %c0_11 = arith.constant 0 : index
    %c0_12 = arith.constant 0 : index
    %24 = vector.load %arg6[%c0_11, %c0_12] : memref<128x128xf32, #tpu.memory_space<vmem>>, vector<128x128xf32>
    %cst_13 = arith.constant dense<0.000000e+00> : vector<16x128xf32>
    %25 = tpu.matmul %23, %24, %cst_13 {dimension_numbers = #tpu.dot_dimension_numbers<[1], [0], [0], [1], [0, 0, 1, 1], [], []>} : vector<16x128xf32>, vector<128x128xf32>, vector<16x128xf32> -> vector<16x128xf32>
    %c0_14 = arith.constant 0 : index
    %c0_15 = arith.constant 0 : index
    %26 = vector.load %arg7[%c0_14, %c0_15] : memref<1x128xf32, #tpu.memory_space<vmem>>, vector<1x128xf32>
    %27 = vector.broadcast %26 : vector<1x128xf32> to vector<16x128xf32>
    %28 = arith.addf %25, %27 : vector<16x128xf32>
    %cst_16 = arith.constant 0.000000e+00 : f32
    %29 = vector.broadcast %cst_16 : f32 to vector<16x128xf32>
    %30 = arith.maximumf %28, %29 : vector<16x128xf32>
    %c0_17 = arith.constant 0 : index
    %c0_18 = arith.constant 0 : index
    %31 = vector.load %arg8[%c0_17, %c0_18] : memref<128x128xf32, #tpu.memory_space<vmem>>, vector<128x128xf32>
    %cst_19 = arith.constant dense<0.000000e+00> : vector<16x128xf32>
    %32 = tpu.matmul %30, %31, %cst_19 {dimension_numbers = #tpu.dot_dimension_numbers<[1], [0], [0], [1], [0, 0, 1, 1], [], []>} : vector<16x128xf32>, vector<128x128xf32>, vector<16x128xf32> -> vector<16x128xf32>
    %c0_20 = arith.constant 0 : index
    %c0_21 = arith.constant 0 : index
    %33 = vector.load %arg9[%c0_20, %c0_21] : memref<1x128xf32, #tpu.memory_space<vmem>>, vector<1x128xf32>
    %34 = vector.broadcast %33 : vector<1x128xf32> to vector<16x128xf32>
    %35 = arith.addf %32, %34 : vector<16x128xf32>
    %c0_22 = arith.constant 0 : index
    %c0_23 = arith.constant 0 : index
    %36 = vector.load %arg10[%c0_22, %c0_23] : memref<16x128xf32, #tpu.memory_space<vmem>>, vector<16x128xf32>
    tpu.vector_store %arg10[%c0_22, %c0_23], %35 {strides = array<i32>} : memref<16x128xf32, #tpu.memory_space<vmem>>, vector<16x128xf32>,
    return
  }
  func.func @transform_0(%arg0: i32) -> (i32, i32) {
    %c0_i32 = arith.constant 0 : i32
    %c0_i32_0 = arith.constant 0 : i32
    return %arg0, %c0_i32 : i32, i32
  }
  func.func @transform_1(%arg0: i32) -> (i32, i32) {
    %c0_i32 = arith.constant 0 : i32
    %c0_i32_0 = arith.constant 0 : i32
    return %arg0, %c0_i32 : i32, i32
  }
  func.func @transform_2(%arg0: i32) -> (i32, i32) {
    %c0_i32 = arith.constant 0 : i32
    %c0_i32_0 = arith.constant 0 : i32
    %c0_i32_1 = arith.constant 0 : i32
    return %c0_i32, %c0_i32_0 : i32, i32
  }
  func.func @transform_3(%arg0: i32) -> (i32, i32) {
    %c0_i32 = arith.constant 0 : i32
    %c0_i32_0 = arith.constant 0 : i32
    %c0_i32_1 = arith.constant 0 : i32
    return %c0_i32, %c0_i32_0 : i32, i32
  }
  func.func @transform_4(%arg0: i32) -> (i32, i32) {
    %c0_i32 = arith.constant 0 : i32
    %c0_i32_0 = arith.constant 0 : i32
    %c0_i32_1 = arith.constant 0 : i32
    return %c0_i32, %c0_i32_0 : i32, i32
  }
  func.func @transform_5(%arg0: i32) -> (i32, i32) {
    %c0_i32 = arith.constant 0 : i32
    %c0_i32_0 = arith.constant 0 : i32
    %c0_i32_1 = arith.constant 0 : i32
    return %c0_i32, %c0_i32_0 : i32, i32
  }
  func.func @transform_6(%arg0: i32) -> (i32, i32) {
    %c0_i32 = arith.constant 0 : i32
    %c0_i32_0 = arith.constant 0 : i32
    %c0_i32_1 = arith.constant 0 : i32
    return %c0_i32, %c0_i32_0 : i32, i32
  }
  func.func @transform_7(%arg0: i32) -> (i32, i32) {
    %c0_i32 = arith.constant 0 : i32
    %c0_i32_0 = arith.constant 0 : i32
    %c0_i32_1 = arith.constant 0 : i32
    return %c0_i32, %c0_i32_0 : i32, i32
  }
  func.func @transform_8(%arg0: i32) -> (i32, i32) {
    %c0_i32 = arith.constant 0 : i32
    %c0_i32_0 = arith.constant 0 : i32
    %c0_i32_1 = arith.constant 0 : i32
    return %c0_i32, %c0_i32_0 : i32, i32
  }
  func.func @transform_9(%arg0: i32) -> (i32, i32) {
    %c0_i32 = arith.constant 0 : i32
    %c0_i32_0 = arith.constant 0 : i32
    return %arg0, %c0_i32 : i32, i32
  }
}

</mosaic_0001>

<bundles_post_ra>
// kernel: tpu_custom_call.1
= control target key start
LH: loop header
LB: loop body
LE: loop exit
PB: predicated region body
PF: predicated region fallthrough
CT: control target
= control target key end

     0   :  { %14 = vsyncpa [#allocation3], 0  ;;  %s580_s0 = inlined_call_operand.vmem [shape: f32[16,16], index: 0, kind: input, shape index: {}]   ;;  %s581_s1 = inlined_call_operand.vmem [shape: s32[16,2], index: 1, kind: input, shape index: {}]   ;;  %s582_s2 = inlined_call_operand.hbm [shape: f32[128,128], index: 2, kind: input, shape index: {}]   ;;  %s583_s3 = inlined_call_operand.hbm [shape: f32[16,128], index: 3, kind: input, shape index: {}]   ;;  %s584_s4 = inlined_call_operand.vmem [shape: f32[1,128], index: 4, kind: input, shape index: {}]   ;;  %s585_s5 = inlined_call_operand.hbm [shape: f32[128,128], index: 5, kind: input, shape index: {}]   ;;  %s586_s6 = inlined_call_operand.vmem [shape: f32[1,128], index: 6, kind: input, shape index: {}]   ;;  %s587_s7 = inlined_call_operand.hbm [shape: f32[128,128], index: 7, kind: input, shape index: {}]   ;;  %s588_s8 = inlined_call_operand.vmem [shape: f32[1,128], index: 8, kind: input, shape index: {}]   ;;  %s589_s9 = inlined_call_operand.hbm [shape: f32[16,128], index: 9, kind: output, shape index: {}]  }
   0x1   :  { %15 = vsyncpa [#allocation6], 0 }
   0x2   :  { %16 = vsyncpa [#allocation9], 0 }
   0x3   :  { %17 = vsyncpa [#allocation4], 0  ;;  %s39_s11 = sshll.u32 %s583_s3, 4  ;;  %s469_s12 = smov [#allocation5]   ;;  %s40_s11 = int_to_ptr.hbm [resolvable:$true] %s39_s11 }
   0x4   :  { %s41_s13 = sshll.u32 %s469_s12, 4  ;;  %s26_s16 = sshll.u32 %s582_s2, 4  ;;  %s42_s13 = int_to_ptr.vmem [resolvable:$true] %s41_s13  ;;  %s27_s16 = int_to_ptr.hbm [resolvable:$true] %s26_s16 }
   0x5   :  { %s470_s17 = smov 128   ;;  %s471_s18 = smov 8  }
   0x6   :  { %47 = dma.hbm_to_vmem [thread:$0]  %s40_s11, 256, %s42_s13, [#allocation6], %s470_s17, %s470_s17, %s471_s18  }
   0x7   :  { %s472_s19 = smov [#allocation2]   ;;  %s54_s3 = sshll.u32 %s585_s5, 4  ;;  %s55_s3 = int_to_ptr.hbm [resolvable:$true] %s54_s3 }
   0x8   :  { %s28_s20 = sshll.u32 %s472_s19, 4  ;;  %s69_s24 = sshll.u32 %s587_s7, 4  ;;  %s29_s20 = int_to_ptr.vmem [resolvable:$true] %s28_s20  ;;  %s70_s24 = int_to_ptr.hbm [resolvable:$true] %s69_s24 }
   0x9   :  { %34 = dma.hbm_to_vmem [thread:$0]  %s27_s16, 2048, %s29_s20, [#allocation3], %s470_s17, %s470_s17, %s471_s18  }
   0xa   :  { %s473_s25 = smov [#allocation7]   ;;  %s474_s27 = smov [#allocation8]  }
   0xb   :  { %s56_s26 = sshll.u32 %s473_s25, 4  ;;  %s71_s5 = sshll.u32 %s474_s27, 4  ;;  %s57_s26 = int_to_ptr.vmem [resolvable:$true] %s56_s26  ;;  %s72_s5 = int_to_ptr.vmem [resolvable:$true] %s71_s5 }
   0xc   :  { %62 = dma.hbm_to_vmem [thread:$0]  %s55_s3, 2048, %s57_s26, [#allocation6], %s470_s17, %s470_s17, %s471_s18  }
   0xd   :  { %77 = dma.hbm_to_vmem [thread:$0]  %s70_s24, 2048, %s72_s5, [#allocation9], %s470_s17, %s470_s17, %s471_s18  }
   0xe   :  { %461 = dma.done.wait [#allocation3], 2048  }
   0xf   :  { %462 = vsyncadd [#allocation3], 4294965248 }
  0x10   :  { %463 = dma.done.wait [#allocation6], 2304  }
  0x11   :  { %464 = vsyncadd [#allocation6], 4294964992 }
  0x12   :  { %465 = dma.done.wait [#allocation9], 2048  }
  0x13   :  { %466 = vsyncadd [#allocation9], 4294965248  ;;  %v475_v0 = vmov 0   ;;  %v101_v1 = vld [vmem:[%s581_s1 + $0x8] sm:$0xff]  ;;  %v100_v2 = vld [vmem:[%s581_s1] sm:$0xff]  ;;  %v476_v8 = vmov 1   ;;  %v102_v30 = vlaneseq }
  0x14   :  { %336 = vset.pattern.permute.xlu1 %v475_v0  ;;  %334 = vset.pattern.permute.xlu0 %v475_v0  ;;  %v145_v3 = vld [vmem:[#allocation2 + $0x78] sm:$0xff]  ;;  %v144_v4 = vld [vmem:[#allocation2 + $0x70] sm:$0xff]  ;;  %v143_v5 = vld [vmem:[#allocation2 + $0x68] sm:$0xff]  ;;  %vm169_vm0 = vcmask 130048   ;;  %v477_v41 = vmov 0.0   ;;  %s478_s19 = smov [#allocation10]  }
  0x15   :  { %108 = vperm.xlu1 %336, %v101_v1   ;;  %105 = vperm.xlu0 %334, %v100_v2   ;;  %v142_v6 = vld [vmem:[#allocation2 + $0x60] sm:$0xff]  ;;  %v141_v7 = vld [vmem:[#allocation2 + $0x58] sm:$0xff]  ;;  %v140_v9 = vld [vmem:[#allocation2 + $0x50] sm:$0xff]  ;;  %v103_v35 = vand.u32 127, %v102_v30  ;;  %s301_s20 = sshll.u32 %s478_s19, 4  ;;  %s302_s20 = int_to_ptr.vmem [resolvable:$true] %s301_s20 }
  0x16   :  { %146 = vmatpush.msra.mxu0 %v145_v3  ;;  %v139_v10 = vld [vmem:[#allocation2 + $0x48] sm:$0xff]  ;;  %v138_v11 = vld [vmem:[#allocation2 + $0x40] sm:$0xff]  ;;  %v137_v12 = vld [vmem:[#allocation2 + $0x38] sm:$0xff] }
  0x17   :  { %v136_v13 = vld [vmem:[#allocation2 + $0x30] sm:$0xff]  ;;  %v135_v14 = vld [vmem:[#allocation2 + $0x28] sm:$0xff]  ;;  %v134_v15 = vld [vmem:[#allocation2 + $0x20] sm:$0xff] }
  0x18   :  { %147 = vmatpush.msra.mxu0 %v144_v4  ;;  %v133_v16 = vld [vmem:[#allocation2 + $0x18] sm:$0xff]  ;;  %v132_v17 = vld [vmem:[#allocation2 + $0x10] sm:$0xff]  ;;  %v131_v18 = vld [vmem:[#allocation2 + $0x8] sm:$0xff] }
  0x19   :  { %v99_v19 = vld [vmem:[#allocation5 + $0x8] sm:$0xff]  ;;  %v130_v20 = vld [vmem:[#allocation2] sm:$0xff]  ;;  %v220_v26 = vld [vmem:[#allocation7 + $0x68] sm:$0xff] }
  0x1a   :  { %148 = vmatpush.msra.mxu0 %v143_v5  ;;  %190 = vmatpush.msra.mxu1 %v99_v19  ;;  %v98_v21 = vld [vmem:[#allocation5] sm:$0xff]  ;;  %v97_v23 = vld [vmem:[%s580_s0 + $0x8] sm:$0xff]  ;;  %v219_v27 = vld [vmem:[#allocation7 + $0x60] sm:$0xff] }
  0x1b   :  { %v96_v22 = vld [vmem:[%s580_s0] sm:$0xff]  ;;  %v222_v24 = vld [vmem:[#allocation7 + $0x78] sm:$0xff]  ;;  %v216_v32 = vld [vmem:[#allocation7 + $0x48] sm:$0xff] }
  0x1c   :  { %149 = vmatpush.msra.mxu0 %v142_v6  ;;  %191 = vmatpush.msra.mxu1 %v98_v21  ;;  %v221_v25 = vld [vmem:[#allocation7 + $0x70] sm:$0xff]  ;;  %v218_v28 = vld [vmem:[#allocation7 + $0x58] sm:$0xff]  ;;  %v215_v34 = vld [vmem:[#allocation7 + $0x40] sm:$0xff] }
  0x1d   :  { %337 = vset.pattern.permute.xlu1 %v476_v8  ;;  %335 = vset.pattern.permute.xlu0 %v476_v8  ;;  %v217_v29 = vld [vmem:[#allocation7 + $0x50] sm:$0xff]  ;;  %v214_v36 = vld [vmem:[#allocation7 + $0x38] sm:$0xff]  ;;  %v212_v38 = vld [vmem:[#allocation7 + $0x28] sm:$0xff] }
  0x1e   :  { %120 = vperm.xlu1 %337, %v101_v1   ;;  %117 = vperm.xlu0 %335, %v100_v2   ;;  %v213_v37 = vld [vmem:[#allocation7 + $0x30] sm:$0xff]  ;;  %v211_v40 = vld [vmem:[#allocation7 + $0x20] sm:$0xff]  ;;  %v210_v49 = vld [vmem:[#allocation7 + $0x18] sm:$0xff] }
  0x1f   :  { %150 = vmatpush.msra.mxu0 %v141_v7  ;;  %322 = vmatmul.msk.f32.vlgmr.msra.gmra.mxu1 %vm169_vm0, %v96_v22  ;;  %v209_v50 = vld [vmem:[#allocation7 + $0x10] sm:$0xff]  ;;  %v208_v51 = vld [vmem:[#allocation7 + $0x8] sm:$0xff]  ;;  %v207_v52 = vld [vmem:[#allocation7] sm:$0xff] }
  0x20   :  { %227 = vmatpush.msra.mxu2 %v222_v24  ;;  %v267_v53 = vld [vmem:[#allocation8 + $0x78] sm:$0xff]  ;;  %v266_v54 = vld [vmem:[#allocation8 + $0x70] sm:$0xff]  ;;  %v265_v55 = vld [vmem:[#allocation8 + $0x68] sm:$0xff] }
  0x21   :  { %151 = vmatpush.msra.mxu0 %v140_v9  ;;  %272 = vmatpush.msra.mxu3 %v267_v53  ;;  %v264_v56 = vld [vmem:[#allocation8 + $0x60] sm:$0xff]  ;;  %v263_v57 = vld [vmem:[#allocation8 + $0x58] sm:$0xff]  ;;  %v262_v58 = vld [vmem:[#allocation8 + $0x50] sm:$0xff] }
  0x22   :  { %228 = vmatpush.msra.mxu2 %v221_v25  ;;  %v261_v59 = vld [vmem:[#allocation8 + $0x48] sm:$0xff]  ;;  %v260_v60 = vld [vmem:[#allocation8 + $0x40] sm:$0xff]  ;;  %v259_v62 = vld [vmem:[#allocation8 + $0x38] sm:$0xff] }
  0x23   :  { %152 = vmatpush.msra.mxu0 %v139_v10  ;;  %273 = vmatpush.msra.mxu3 %v266_v54  ;;  %v338_v63 = vld [vmem:[%s584_s4] ss:$0 sm:$0xff]  ;;  %v257_v3 = vld [vmem:[#allocation8 + $0x28] sm:$0xff]  ;;  %v256_v5 = vld [vmem:[#allocation8 + $0x20] sm:$0xff] }
  0x24   :  { %229 = vmatpush.msra.mxu2 %v220_v26  ;;  %v258_v0 = vld [vmem:[#allocation8 + $0x30] sm:$0xff]  ;;  %v255_v7 = vld [vmem:[#allocation8 + $0x18] sm:$0xff] }
  0x25   :  { %153 = vmatpush.msra.mxu0 %v138_v11  ;;  %274 = vmatpush.msra.mxu3 %v265_v55 }
  0x26   :  { %230 = vmatpush.msra.mxu2 %v219_v27 }
  0x27   :  { %154 = vmatpush.msra.mxu0 %v137_v12  ;;  %323 = vmatmul.msk.f32.gmra.mxu1 %vm169_vm0, %v97_v23  ;;  %v340_v23 = vld [vmem:[%s588_s8] ss:$0 sm:$0xff] }
  0x28   :  { %231 = vmatpush.msra.mxu2 %v218_v28  ;;  %275 = vmatpush.msra.mxu3 %v264_v56 }
  0x29   :  { %155 = vmatpush.msra.mxu0 %v136_v13  ;;  %v254_v13 = vld [vmem:[#allocation8 + $0x10] sm:$0xff] }
  0x2a   :  { %232 = vmatpush.msra.mxu2 %v217_v29  ;;  %276 = vmatpush.msra.mxu3 %v263_v57 }
  0x2b   :  { %156 = vmatpush.msra.mxu0 %v135_v14  ;;  %v253_v14 = vld [vmem:[#allocation8 + $0x8] sm:$0xff] }
  0x2c   :  { %233 = vmatpush.msra.mxu2 %v216_v32  ;;  %277 = vmatpush.msra.mxu3 %v262_v58 }
  0x2d   :  { %157 = vmatpush.msra.mxu0 %v134_v15  ;;  %v252_v15 = vld [vmem:[#allocation8] sm:$0xff] }
  0x2e   :  { %234 = vmatpush.msra.mxu2 %v215_v34  ;;  %278 = vmatpush.msra.mxu3 %v261_v59 }
  0x2f   :  { %158 = vmatpush.msra.mxu0 %v133_v16  ;;  %v339_v16 = vld [vmem:[%s586_s6] ss:$0 sm:$0xff]  ;;  %s303_s6 = sshll.u32 %s589_s9, 4  ;;  %s304_s6 = int_to_ptr.hbm [resolvable:$true] %s303_s6 }
  0x30   :  { %235 = vmatpush.msra.mxu2 %v214_v36  ;;  %279 = vmatpush.msra.mxu3 %v260_v60 }
  0x31   :  { %159 = vmatpush.msra.mxu0 %v132_v17 }
  0x32   :  { %236 = vmatpush.msra.mxu2 %v213_v37  ;;  %280 = vmatpush.msra.mxu3 %v259_v62 }
  0x33   :  { %160 = vmatpush.msra.mxu0 %v131_v18 }
  0x34   :  { %237 = vmatpush.msra.mxu2 %v212_v38  ;;  %281 = vmatpush.msra.mxu3 %v258_v0 }
  0x35   :  { %161 = vmatpush.msra.mxu0 %v130_v20 }
  0x36   :  { %238 = vmatpush.msra.mxu2 %v211_v40  ;;  %282 = vmatpush.msra.mxu3 %v257_v3 }
  0x38   :  { %239 = vmatpush.msra.mxu2 %v210_v49  ;;  %283 = vmatpush.msra.mxu3 %v256_v5 }
  0x3a   :  { %240 = vmatpush.msra.mxu2 %v209_v50  ;;  %284 = vmatpush.msra.mxu3 %v255_v7 }
  0x3c   :  { %241 = vmatpush.msra.mxu2 %v208_v51  ;;  %285 = vmatpush.msra.mxu3 %v254_v13 }
  0x3e   :  { %242 = vmatpush.msra.mxu2 %v207_v52  ;;  %286 = vmatpush.msra.mxu3 %v253_v14 }
  0x40   :  { %287 = vmatpush.msra.mxu3 %v252_v15 }
  0x87   :  { %v106_v31 = vpop.permute.xlu0 %105  ;;  %v109_v33 = vpop.permute.xlu1 %108 }
  0x88   :  { %vm110_vm1 = vcmp.eq.s32.totalorder %v103_v35, %v106_v31  ;;  %vm111_vm3 = vcmp.eq.s32.totalorder %v103_v35, %v109_v33 }
  0x89   :  { %v318_v42 = vsel %vm110_vm1, 1.0, %v477_v41  ;;  %v319_v46 = vsel %vm111_vm3, 1.0, %v477_v41 }
  0x90   :  { %v118_v39 = vpop.permute.xlu0 %117  ;;  %v121_v43 = vpop.permute.xlu1 %120 }
  0x91   :  { %vm122_vm2 = vcmp.eq.s32.totalorder %v103_v35, %v118_v39  ;;  %vm123_vm4 = vcmp.eq.s32.totalorder %v103_v35, %v121_v43 }
  0x92   :  { %v320_v44 = vsel %vm122_vm2, 1.0, %v477_v41  ;;  %v321_v47 = vsel %vm123_vm4, 1.0, %v477_v41 }
  0x93   :  { %v128_v45 = vadd.f32 %v320_v44, %v318_v42  ;;  %v129_v48 = vadd.f32 %v321_v47, %v319_v46 }
  0x95   :  { %162 = vmatmul.f32.vlgmr.msra.gmra.mxu0 %v128_v45 }
  0x9c   :  { %v193_v61 = vpop.f32.mrf.mxu1 }
  0x9d   :  { %165 = vmatmul.f32.gmra.mxu0 %v129_v48 }
  0xa4   :  { %v196_v8 = vpop.f32.mrf.mxu1 }
 0x112   :  { %v163_v1 = vpop.f32.mrf.mxu0 }
 0x113   :  { %v194_v2 = vadd.f32 %v193_v61, %v163_v1 }
 0x115   :  { %v203_v4 = vadd.f32 %v338_v63, %v194_v2 }
 0x117   :  { %v205_v6 = vmax.f32 %v203_v4, 0.0 }
 0x119   :  { %243 = vmatmul.f32.vlgmr.msra.gmra.mxu2 %v205_v6 }
 0x11a   :  { %v166_v9 = vpop.f32.mrf.mxu0 }
 0x11b   :  { %v197_v10 = vadd.f32 %v196_v8, %v166_v9 }
 0x11d   :  { %v204_v11 = vadd.f32 %v338_v63, %v197_v10 }
 0x11f   :  { %v206_v12 = vmax.f32 %v204_v11, 0.0 }
 0x121   :  { %246 = vmatmul.f32.gmra.mxu2 %v206_v12 }
 0x19c   :  { %v244_v17 = vpop.f32.mrf.mxu2 }
 0x19d   :  { %v245_v18 = vadd.f32 %v339_v16, %v244_v17 }
 0x19f   :  { %v250_v19 = vmax.f32 %v245_v18, 0.0 }
 0x1a1   :  { %288 = vmatmul.f32.vlgmr.msra.gmra.mxu3 %v250_v19 }
 0x1a4   :  { %v247_v20 = vpop.f32.mrf.mxu2 }
 0x1a5   :  { %v248_v21 = vadd.f32 %v339_v16, %v247_v20 }
 0x1a7   :  { %v251_v22 = vmax.f32 %v248_v21, 0.0 }
 0x1a9   :  { %291 = vmatmul.f32.gmra.mxu3 %v251_v22 }
 0x224   :  { %v289_v24 = vpop.f32.mrf.mxu3 }
 0x225   :  { %v290_v25 = vadd.f32 %v340_v23, %v289_v24 }
 0x227   :  { %295 = vst [vmem:[#allocation10] sm:$0xff] %v290_v25 }
 0x22c   :  { %v292_v26 = vpop.f32.mrf.mxu3 }
 0x22d   :  { %v293_v27 = vadd.f32 %v340_v23, %v292_v26 }
 0x22f   :  { %296 = vst [vmem:[#allocation10 + $0x8] sm:$0xff] %v293_v27 }
 0x230   :  { %309 = dma.vmem_to_hbm [thread:$0]  %s302_s20, 256, %s304_s6, [#allocation4], %s470_s17, %s470_s17, %s471_s18  }
 0x231   :  { %467 = dma.done.wait [#allocation4], 256  }
 0x232   :  { %468 = vsyncadd [#allocation4], 4294967040 }
 0x233   :  { %314 = vsyncpa [#allocation3], 1 }
 0x234   :  { %315 = vsyncpa [#allocation6], 1 }
 0x235   :  { %316 = vsyncpa [#allocation9], 1 }
 0x236   :  { %317 = vsyncpa [#allocation4], 1 }

// kernel: tpu_custom_call.1
= control target key start
LH: loop header
LB: loop body
LE: loop exit
PB: predicated region body
PF: predicated region fallthrough
CT: control target
= control target key end

     0   :  { %14 = vsyncpa [#allocation3], 0  ;;  %s580_s0 = inlined_call_operand.vmem [shape: f32[16,16], index: 0, kind: input, shape index: {}]   ;;  %s581_s1 = inlined_call_operand.vmem [shape: s32[16,2], index: 1, kind: input, shape index: {}]   ;;  %s582_s2 = inlined_call_operand.hbm [shape: f32[128,128], index: 2, kind: input, shape index: {}]   ;;  %s583_s3 = inlined_call_operand.hbm [shape: f32[16,128], index: 3, kind: input, shape index: {}]   ;;  %s584_s4 = inlined_call_operand.vmem [shape: f32[1,128], index: 4, kind: input, shape index: {}]   ;;  %s585_s5 = inlined_call_operand.hbm [shape: f32[128,128], index: 5, kind: input, shape index: {}]   ;;  %s586_s6 = inlined_call_operand.vmem [shape: f32[1,128], index: 6, kind: input, shape index: {}]   ;;  %s587_s7 = inlined_call_operand.hbm [shape: f32[128,128], index: 7, kind: input, shape index: {}]   ;;  %s588_s8 = inlined_call_operand.vmem [shape: f32[1,128], index: 8, kind: input, shape index: {}]   ;;  %s589_s9 = inlined_call_operand.hbm [shape: f32[16,128], index: 9, kind: output, shape index: {}]  }
   0x1   :  { %15 = vsyncpa [#allocation6], 0 }
   0x2   :  { %16 = vsyncpa [#allocation9], 0 }
   0x3   :  { %17 = vsyncpa [#allocation4], 0  ;;  %s39_s11 = sshll.u32 %s583_s3, 4  ;;  %s469_s12 = smov [#allocation5]   ;;  %s40_s11 = int_to_ptr.hbm [resolvable:$true] %s39_s11 }
   0x4   :  { %s41_s13 = sshll.u32 %s469_s12, 4  ;;  %s26_s16 = sshll.u32 %s582_s2, 4  ;;  %s42_s13 = int_to_ptr.vmem [resolvable:$true] %s41_s13  ;;  %s27_s16 = int_to_ptr.hbm [resolvable:$true] %s26_s16 }
   0x5   :  { %s470_s17 = smov 128   ;;  %s471_s18 = smov 8  }
   0x6   :  { %47 = dma.hbm_to_vmem [thread:$0]  %s40_s11, 256, %s42_s13, [#allocation6], %s470_s17, %s470_s17, %s471_s18  }
   0x7   :  { %s472_s19 = smov [#allocation2]   ;;  %s54_s3 = sshll.u32 %s585_s5, 4  ;;  %s55_s3 = int_to_ptr.hbm [resolvable:$true] %s54_s3 }
   0x8   :  { %s28_s20 = sshll.u32 %s472_s19, 4  ;;  %s69_s24 = sshll.u32 %s587_s7, 4  ;;  %s29_s20 = int_to_ptr.vmem [resolvable:$true] %s28_s20  ;;  %s70_s24 = int_to_ptr.hbm [resolvable:$true] %s69_s24 }
   0x9   :  { %34 = dma.hbm_to_vmem [thread:$0]  %s27_s16, 2048, %s29_s20, [#allocation3], %s470_s17, %s470_s17, %s471_s18  }
   0xa   :  { %s473_s25 = smov [#allocation7]   ;;  %s474_s27 = smov [#allocation8]  }
   0xb   :  { %s56_s26 = sshll.u32 %s473_s25, 4  ;;  %s71_s5 = sshll.u32 %s474_s27, 4  ;;  %s57_s26 = int_to_ptr.vmem [resolvable:$true] %s56_s26  ;;  %s72_s5 = int_to_ptr.vmem [resolvable:$true] %s71_s5 }
   0xc   :  { %62 = dma.hbm_to_vmem [thread:$0]  %s55_s3, 2048, %s57_s26, [#allocation6], %s470_s17, %s470_s17, %s471_s18  }
   0xd   :  { %77 = dma.hbm_to_vmem [thread:$0]  %s70_s24, 2048, %s72_s5, [#allocation9], %s470_s17, %s470_s17, %s471_s18  }
   0xe   :  { %461 = dma.done.wait [#allocation3], 2048  }
   0xf   :  { %462 = vsyncadd [#allocation3], 4294965248 }
  0x10   :  { %463 = dma.done.wait [#allocation6], 2304  }
  0x11   :  { %464 = vsyncadd [#allocation6], 4294964992 }
  0x12   :  { %465 = dma.done.wait [#allocation9], 2048  }
  0x13   :  { %466 = vsyncadd [#allocation9], 4294965248  ;;  %v475_v0 = vmov 0   ;;  %v101_v1 = vld [vmem:[%s581_s1 + $0x8] sm:$0xff]  ;;  %v100_v2 = vld [vmem:[%s581_s1] sm:$0xff]  ;;  %v476_v8 = vmov 1   ;;  %v102_v30 = vlaneseq }
  0x14   :  { %336 = vset.pattern.permute.xlu1 %v475_v0  ;;  %334 = vset.pattern.permute.xlu0 %v475_v0  ;;  %v145_v3 = vld [vmem:[#allocation2 + $0x78] sm:$0xff]  ;;  %v144_v4 = vld [vmem:[#allocation2 + $0x70] sm:$0xff]  ;;  %v143_v5 = vld [vmem:[#allocation2 + $0x68] sm:$0xff]  ;;  %vm169_vm0 = vcmask 130048   ;;  %v477_v41 = vmov 0.0   ;;  %s478_s19 = smov [#allocation10]  }
  0x15   :  { %108 = vperm.xlu1 %336, %v101_v1   ;;  %105 = vperm.xlu0 %334, %v100_v2   ;;  %v142_v6 = vld [vmem:[#allocation2 + $0x60] sm:$0xff]  ;;  %v141_v7 = vld [vmem:[#allocation2 + $0x58] sm:$0xff]  ;;  %v140_v9 = vld [vmem:[#allocation2 + $0x50] sm:$0xff]  ;;  %v103_v35 = vand.u32 127, %v102_v30  ;;  %s301_s20 = sshll.u32 %s478_s19, 4  ;;  %s302_s20 = int_to_ptr.vmem [resolvable:$true] %s301_s20 }
  0x16   :  { %146 = vmatpush.msra.mxu0 %v145_v3  ;;  %v139_v10 = vld [vmem:[#allocation2 + $0x48] sm:$0xff]  ;;  %v138_v11 = vld [vmem:[#allocation2 + $0x40] sm:$0xff]  ;;  %v137_v12 = vld [vmem:[#allocation2 + $0x38] sm:$0xff] }
  0x17   :  { %v136_v13 = vld [vmem:[#allocation2 + $0x30] sm:$0xff]  ;;  %v135_v14 = vld [vmem:[#allocation2 + $0x28] sm:$0xff]  ;;  %v134_v15 = vld [vmem:[#allocation2 + $0x20] sm:$0xff] }
  0x18   :  { %147 = vmatpush.msra.mxu0 %v144_v4  ;;  %v133_v16 = vld [vmem:[#allocation2 + $0x18] sm:$0xff]  ;;  %v132_v17 = vld [vmem:[#allocation2 + $0x10] sm:$0xff]  ;;  %v131_v18 = vld [vmem:[#allocation2 + $0x8] sm:$0xff] }
  0x19   :  { %v99_v19 = vld [vmem:[#allocation5 + $0x8] sm:$0xff]  ;;  %v130_v20 = vld [vmem:[#allocation2] sm:$0xff]  ;;  %v220_v26 = vld [vmem:[#allocation7 + $0x68] sm:$0xff] }
  0x1a   :  { %148 = vmatpush.msra.mxu0 %v143_v5  ;;  %190 = vmatpush.msra.mxu1 %v99_v19  ;;  %v98_v21 = vld [vmem:[#allocation5] sm:$0xff]  ;;  %v97_v23 = vld [vmem:[%s580_s0 + $0x8] sm:$0xff]  ;;  %v219_v27 = vld [vmem:[#allocation7 + $0x60] sm:$0xff] }
  0x1b   :  { %v96_v22 = vld [vmem:[%s580_s0] sm:$0xff]  ;;  %v222_v24 = vld [vmem:[#allocation7 + $0x78] sm:$0xff]  ;;  %v216_v32 = vld [vmem:[#allocation7 + $0x48] sm:$0xff] }
  0x1c   :  { %149 = vmatpush.msra.mxu0 %v142_v6  ;;  %191 = vmatpush.msra.mxu1 %v98_v21  ;;  %v221_v25 = vld [vmem:[#allocation7 + $0x70] sm:$0xff]  ;;  %v218_v28 = vld [vmem:[#allocation7 + $0x58] sm:$0xff]  ;;  %v215_v34 = vld [vmem:[#allocation7 + $0x40] sm:$0xff] }
  0x1d   :  { %337 = vset.pattern.permute.xlu1 %v476_v8  ;;  %335 = vset.pattern.permute.xlu0 %v476_v8  ;;  %v217_v29 = vld [vmem:[#allocation7 + $0x50] sm:$0xff]  ;;  %v214_v36 = vld [vmem:[#allocation7 + $0x38] sm:$0xff]  ;;  %v212_v38 = vld [vmem:[#allocation7 + $0x28] sm:$0xff] }
  0x1e   :  { %120 = vperm.xlu1 %337, %v101_v1   ;;  %117 = vperm.xlu0 %335, %v100_v2   ;;  %v213_v37 = vld [vmem:[#allocation7 + $0x30] sm:$0xff]  ;;  %v211_v40 = vld [vmem:[#allocation7 + $0x20] sm:$0xff]  ;;  %v210_v49 = vld [vmem:[#allocation7 + $0x18] sm:$0xff] }
  0x1f   :  { %150 = vmatpush.msra.mxu0 %v141_v7  ;;  %322 = vmatmul.msk.f32.vlgmr.msra.gmra.mxu1 %vm169_vm0, %v96_v22  ;;  %v209_v50 = vld [vmem:[#allocation7 + $0x10] sm:$0xff]  ;;  %v208_v51 = vld [vmem:[#allocation7 + $0x8] sm:$0xff]  ;;  %v207_v52 = vld [vmem:[#allocation7] sm:$0xff] }
  0x20   :  { %227 = vmatpush.msra.mxu2 %v222_v24  ;;  %v267_v53 = vld [vmem:[#allocation8 + $0x78] sm:$0xff]  ;;  %v266_v54 = vld [vmem:[#allocation8 + $0x70] sm:$0xff]  ;;  %v265_v55 = vld [vmem:[#allocation8 + $0x68] sm:$0xff] }
  0x21   :  { %151 = vmatpush.msra.mxu0 %v140_v9  ;;  %272 = vmatpush.msra.mxu3 %v267_v53  ;;  %v264_v56 = vld [vmem:[#allocation8 + $0x60] sm:$0xff]  ;;  %v263_v57 = vld [vmem:[#allocation8 + $0x58] sm:$0xff]  ;;  %v262_v58 = vld [vmem:[#allocation8 + $0x50] sm:$0xff] }
  0x22   :  { %228 = vmatpush.msra.mxu2 %v221_v25  ;;  %v261_v59 = vld [vmem:[#allocation8 + $0x48] sm:$0xff]  ;;  %v260_v60 = vld [vmem:[#allocation8 + $0x40] sm:$0xff]  ;;  %v259_v62 = vld [vmem:[#allocation8 + $0x38] sm:$0xff] }
  0x23   :  { %152 = vmatpush.msra.mxu0 %v139_v10  ;;  %273 = vmatpush.msra.mxu3 %v266_v54  ;;  %v338_v63 = vld [vmem:[%s584_s4] ss:$0 sm:$0xff]  ;;  %v257_v3 = vld [vmem:[#allocation8 + $0x28] sm:$0xff]  ;;  %v256_v5 = vld [vmem:[#allocation8 + $0x20] sm:$0xff] }
  0x24   :  { %229 = vmatpush.msra.mxu2 %v220_v26  ;;  %v258_v0 = vld [vmem:[#allocation8 + $0x30] sm:$0xff]  ;;  %v255_v7 = vld [vmem:[#allocation8 + $0x18] sm:$0xff] }
  0x25   :  { %153 = vmatpush.msra.mxu0 %v138_v11  ;;  %274 = vmatpush.msra.mxu3 %v265_v55 }
  0x26   :  { %230 = vmatpush.msra.mxu2 %v219_v27 }
  0x27   :  { %154 = vmatpush.msra.mxu0 %v137_v12  ;;  %323 = vmatmul.msk.f32.gmra.mxu1 %vm169_vm0, %v97_v23  ;;  %v340_v23 = vld [vmem:[%s588_s8] ss:$0 sm:$0xff] }
  0x28   :  { %231 = vmatpush.msra.mxu2 %v218_v28  ;;  %275 = vmatpush.msra.mxu3 %v264_v56 }
  0x29   :  { %155 = vmatpush.msra.mxu0 %v136_v13  ;;  %v254_v13 = vld [vmem:[#allocation8 + $0x10] sm:$0xff] }
  0x2a   :  { %232 = vmatpush.msra.mxu2 %v217_v29  ;;  %276 = vmatpush.msra.mxu3 %v263_v57 }
  0x2b   :  { %156 = vmatpush.msra.mxu0 %v135_v14  ;;  %v253_v14 = vld [vmem:[#allocation8 + $0x8] sm:$0xff] }
  0x2c   :  { %233 = vmatpush.msra.mxu2 %v216_v32  ;;  %277 = vmatpush.msra.mxu3 %v262_v58 }
  0x2d   :  { %157 = vmatpush.msra.mxu0 %v134_v15  ;;  %v252_v15 = vld [vmem:[#allocation8] sm:$0xff] }
  0x2e   :  { %234 = vmatpush.msra.mxu2 %v215_v34  ;;  %278 = vmatpush.msra.mxu3 %v261_v59 }
  0x2f   :  { %158 = vmatpush.msra.mxu0 %v133_v16  ;;  %v339_v16 = vld [vmem:[%s586_s6] ss:$0 sm:$0xff]  ;;  %s303_s6 = sshll.u32 %s589_s9, 4  ;;  %s304_s6 = int_to_ptr.hbm [resolvable:$true] %s303_s6 }
  0x30   :  { %235 = vmatpush.msra.mxu2 %v214_v36  ;;  %279 = vmatpush.msra.mxu3 %v260_v60 }
  0x31   :  { %159 = vmatpush.msra.mxu0 %v132_v17 }
  0x32   :  { %236 = vmatpush.msra.mxu2 %v213_v37  ;;  %280 = vmatpush.msra.mxu3 %v259_v62 }
  0x33   :  { %160 = vmatpush.msra.mxu0 %v131_v18 }
  0x34   :  { %237 = vmatpush.msra.mxu2 %v212_v38  ;;  %281 = vmatpush.msra.mxu3 %v258_v0 }
  0x35   :  { %161 = vmatpush.msra.mxu0 %v130_v20 }
  0x36   :  { %238 = vmatpush.msra.mxu2 %v211_v40  ;;  %282 = vmatpush.msra.mxu3 %v257_v3 }
  0x38   :  { %239 = vmatpush.msra.mxu2 %v210_v49  ;;  %283 = vmatpush.msra.mxu3 %v256_v5 }
  0x3a   :  { %240 = vmatpush.msra.mxu2 %v209_v50  ;;  %284 = vmatpush.msra.mxu3 %v255_v7 }
  0x3c   :  { %241 = vmatpush.msra.mxu2 %v208_v51  ;;  %285 = vmatpush.msra.mxu3 %v254_v13 }
  0x3e   :  { %242 = vmatpush.msra.mxu2 %v207_v52  ;;  %286 = vmatpush.msra.mxu3 %v253_v14 }
  0x40   :  { %287 = vmatpush.msra.mxu3 %v252_v15 }
  0x87   :  { %v106_v31 = vpop.permute.xlu0 %105  ;;  %v109_v33 = vpop.permute.xlu1 %108 }
  0x88   :  { %vm110_vm1 = vcmp.eq.s32.totalorder %v103_v35, %v106_v31  ;;  %vm111_vm3 = vcmp.eq.s32.totalorder %v103_v35, %v109_v33 }
  0x89   :  { %v318_v42 = vsel %vm110_vm1, 1.0, %v477_v41  ;;  %v319_v46 = vsel %vm111_vm3, 1.0, %v477_v41 }
  0x90   :  { %v118_v39 = vpop.permute.xlu0 %117  ;;  %v121_v43 = vpop.permute.xlu1 %120 }
  0x91   :  { %vm122_vm2 = vcmp.eq.s32.totalorder %v103_v35, %v118_v39  ;;  %vm123_vm4 = vcmp.eq.s32.totalorder %v103_v35, %v121_v43 }
  0x92   :  { %v320_v44 = vsel %vm122_vm2, 1.0, %v477_v41  ;;  %v321_v47 = vsel %vm123_vm4, 1.0, %v477_v41 }
  0x93   :  { %v128_v45 = vadd.f32 %v320_v44, %v318_v42  ;;  %v129_v48 = vadd.f32 %v321_v47, %v319_v46 }
  0x95   :  { %162 = vmatmul.f32.vlgmr.msra.gmra.mxu0 %v128_v45 }
  0x9c   :  { %v193_v61 = vpop.f32.mrf.mxu1 }
  0x9d   :  { %165 = vmatmul.f32.gmra.mxu0 %v129_v48 }
  0xa4   :  { %v196_v8 = vpop.f32.mrf.mxu1 }
 0x112   :  { %v163_v1 = vpop.f32.mrf.mxu0 }
 0x113   :  { %v194_v2 = vadd.f32 %v193_v61, %v163_v1 }
 0x115   :  { %v203_v4 = vadd.f32 %v338_v63, %v194_v2 }
 0x117   :  { %v205_v6 = vmax.f32 %v203_v4, 0.0 }
 0x119   :  { %243 = vmatmul.f32.vlgmr.msra.gmra.mxu2 %v205_v6 }
 0x11a   :  { %v166_v9 = vpop.f32.mrf.mxu0 }
 0x11b   :  { %v197_v10 = vadd.f32 %v196_v8, %v166_v9 }
 0x11d   :  { %v204_v11 = vadd.f32 %v338_v63, %v197_v10 }
 0x11f   :  { %v206_v12 = vmax.f32 %v204_v11, 0.0 }
 0x121   :  { %246 = vmatmul.f32.gmra.mxu2 %v206_v12 }
 0x19c   :  { %v244_v17 = vpop.f32.mrf.mxu2 }
 0x19d   :  { %v245_v18 = vadd.f32 %v339_v16, %v244_v17 }
 0x19f   :  { %v250_v19 = vmax.f32 %v245_v18, 0.0 }
 0x1a1   :  { %288 = vmatmul.f32.vlgmr.msra.gmra.mxu3 %v250_v19 }
 0x1a4   :  { %v247_v20 = vpop.f32.mrf.mxu2 }
 0x1a5   :  { %v248_v21 = vadd.f32 %v339_v16, %v247_v20 }
 0x1a7   :  { %v251_v22 = vmax.f32 %v248_v21, 0.0 }
 0x1a9   :  { %291 = vmatmul.f32.gmra.mxu3 %v251_v22 }
 0x224   :  { %v289_v24 = vpop.f32.mrf.mxu3 }
 0x225   :  { %v290_v25 = vadd.f32 %v340_v23, %v289_v24 }
 0x227   :  { %295 = vst [vmem:[#allocation10] sm:$0xff] %v290_v25 }
 0x22c   :  { %v292_v26 = vpop.f32.mrf.mxu3 }
 0x22d   :  { %v293_v27 = vadd.f32 %v340_v23, %v292_v26 }
 0x22f   :  { %296 = vst [vmem:[#allocation10 + $0x8] sm:$0xff] %v293_v27 }
 0x230   :  { %309 = dma.vmem_to_hbm [thread:$0]  %s302_s20, 256, %s304_s6, [#allocation4], %s470_s17, %s470_s17, %s471_s18  }
 0x231   :  { %467 = dma.done.wait [#allocation4], 256  }
 0x232   :  { %468 = vsyncadd [#allocation4], 4294967040 }
 0x233   :  { %314 = vsyncpa [#allocation3], 1 }
 0x234   :  { %315 = vsyncpa [#allocation6], 1 }
 0x235   :  { %316 = vsyncpa [#allocation9], 1 }
 0x236   :  { %317 = vsyncpa [#allocation4], 1 }

</bundles_post_ra>
